<compile_context>
chip_gen: v5e
topology: v5e:2x2
jax: 0.10.0
libtpu: 0.0.40
codegen_flags: <defaults>
</compile_context>

<pallas_src>
import functools

import jax
import jax.numpy as jnp
from jax.experimental import pallas as pl
from jax.experimental.pallas import tpu as pltpu


_LANE = 128
# Per-step VMEM budget used by the auto tile heuristic (input double-buffer at the
# lane-padded width + f32 working copies), kept ~8 MiB under the scoped request.
_VMEM_TILE_BUDGET = 24 * 1024 * 1024
_VMEM_LIMIT = 32 * 1024 * 1024


def _sublane_multiple(dtype) -> int:
    """Native sublane packing multiple for the dtype: (8,128) f32, (16,128) bf16, (32,128) int8."""
    itemsize = jnp.dtype(dtype).itemsize
    return {4: 8, 2: 16, 1: 32}.get(itemsize, 8)


def _tile_heuristic(c, dtype):
    """Return (auto_tile_n, live_vmem_bytes_per_row) with lane-padded accounting."""
    itemsize = jnp.dtype(dtype).itemsize
    sub = _sublane_multiple(dtype)
    lanes = pl.cdiv(c, _LANE) * _LANE            # VMEM lane-padded row width
    per_row_in = lanes * itemsize                # one pipeline buffer, per row
    per_row_f32 = 2 * lanes * 4                  # f32 cast + exp temporary
    live_per_row = 2 * per_row_in + per_row_f32  # double-buffered input + temps
    tile_n = _VMEM_TILE_BUDGET // live_per_row
    tile_n = max(sub, (tile_n // sub) * sub)
    return tile_n, live_per_row


def _unlabeled_loss_kernel(cls_ref, out_ref, *, tile_n, n_total):
    """Per-tile partial sum of (logsumexp(row) - max(row)) over valid rows."""
    i = pl.program_id(0)
    x = cls_ref[...].astype(jnp.float32)                       # (tile_n, C)

    # Row validity for the ragged last tile.  Stale garbage (NaN/Inf) in rows past
    # the true batch size cannot escape the row-level select below, so no
    # per-element mask on x is needed.
    row = jax.lax.broadcasted_iota(jnp.int32, (tile_n, 1), 0)  # (tile_n, 1)
    valid = (i * tile_n + row) < n_total                       # (tile_n, 1)

    m = jnp.max(x, axis=1, keepdims=True)                      # (tile_n, 1)
    lse_minus_max = jnp.log(
        jnp.sum(jnp.exp(x - m), axis=1, keepdims=True))        # (tile_n, 1)

    partial = jnp.sum(jnp.where(valid, lse_minus_max, 0.0))    # scalar
    # Lane-dense (1, 8, 128) output block; the wrapper reads [tile, 0, 0].
    out_ref[...] = jnp.full(out_ref.shape, partial, dtype=out_ref.dtype)


def unlabeled_loss_cls(cls, alpha=0.5, tile_n=None):
    """cls: (N, C) float array of logits. Returns scalar loss (float32)."""
    n, c = cls.shape
    sub = _sublane_multiple(cls.dtype)
    auto_tile, live_per_row = _tile_heuristic(c, cls.dtype)

    if tile_n is None:
        tile_n = auto_tile
    if tile_n >= n:
        # Whole batch in one full-extent block (always layout-legal, no raggedness).
        tile_n = n
    elif tile_n % sub != 0:
        raise ValueError(
            f"tile_n={tile_n} must be a multiple of {sub} sublanes for {cls.dtype}")

    num_tiles = pl.cdiv(n, tile_n)
    # 32 MiB scoped VMEM everywhere (raises v5e's 16 MiB default; equals the
    # v6e/v7x default).  Only grow it if even this tile cannot fit the budget
    # (extremely large C).
    vmem_limit = int(max(_VMEM_LIMIT, 1.25 * tile_n * live_per_row + (1 << 20)))

    kernel = functools.partial(_unlabeled_loss_kernel, tile_n=tile_n, n_total=n)
    partials = pl.pallas_call(
        kernel,
        out_shape=jax.ShapeDtypeStruct((num_tiles, 8, 128), jnp.float32),
        grid=(num_tiles,),
        in_specs=[pl.BlockSpec((tile_n, c), lambda i: (i, 0))],
        out_specs=pl.BlockSpec((1, 8, 128), lambda i: (i, 0, 0)),
        compiler_params=pltpu.CompilerParams(
            dimension_semantics=("parallel",),
            vmem_limit_bytes=vmem_limit),
    )(cls)

    total = jnp.sum(partials[:, 0, 0])
    return (alpha * total / n).astype(jnp.float32)


def _reference(cls, alpha=0.5):
    # Pure-JAX reference mirroring the PyTorch module.
    x = cls.astype(jnp.float32)
    labels = jnp.argmax(jax.nn.softmax(x, axis=1), axis=1)
    logp = jax.nn.log_softmax(x, axis=1)
    ce = -jnp.mean(jnp.take_along_axis(logp, labels[:, None], axis=1))
    return alpha * ce


if __name__ == "__main__":
    key = jax.random.PRNGKey(0)
    k1, k2, k3, k4 = jax.random.split(key, 4)

    # Case 1: small single-tile f32 (batch=8, classes=32), auto tile.
    cls1 = jax.random.normal(k1, (8, 32), dtype=jnp.float32)
    loss1 = unlabeled_loss_cls(cls1)
    jax.block_until_ready(loss1)
    ref1 = _reference(cls1)
    assert jnp.allclose(loss1, ref1, atol=1e-5, rtol=1e-5), (loss1, ref1)

    # Case 2: f32 multi-tile with a ragged last tile (3 tiles, 4 masked rows).
    cls2 = jax.random.normal(k2, (20, 32), dtype=jnp.float32)
    loss2 = unlabeled_loss_cls(cls2, alpha=0.5, tile_n=8)
    jax.block_until_ready(loss2)
    ref2 = _reference(cls2)
    assert jnp.allclose(loss2, ref2, atol=1e-5, rtol=1e-5), (loss2, ref2)

    # Case 3: bf16 with a ragged last tile and the bf16 sublane multiple (16).
    cls3 = jax.random.normal(k3, (20, 32), dtype=jnp.float32).astype(jnp.bfloat16)
    loss3 = unlabeled_loss_cls(cls3, alpha=0.25, tile_n=16)
    jax.block_until_ready(loss3)
    ref3 = _reference(cls3, alpha=0.25)
    assert jnp.allclose(loss3, ref3, atol=1e-5, rtol=1e-5), (loss3, ref3)

    # Case 4: batch not a multiple of 8 with auto tiling (single full-extent block).
    cls4 = jax.random.normal(k4, (12, 16), dtype=jnp.float32)
    loss4 = unlabeled_loss_cls(cls4)
    jax.block_until_ready(loss4)
    ref4 = _reference(cls4)
    assert jnp.allclose(loss4, ref4, atol=1e-5, rtol=1e-5), (loss4, ref4)

    print("KERNEL_OK")
</pallas_src>

<mosaic_0001>
module attributes {stable_mosaic.version = 11 : i64} {
  func.func @_unlabeled_loss_kernel(%arg0: i32, %arg1: memref<8x32xf32, #tpu.memory_space<vmem>>, %arg2: memref<1x8x128xf32, #tpu.memory_space<vmem>>) attributes {dimension_semantics = [#tpu.dimension_semantics<parallel>], iteration_bounds = array<i64: 1>, scalar_prefetch = 0 : i64, scratch_operands = 0 : i64, tpu.core_type = #tpu.core_type<tc>, window_params = [{transform_indices = @transform_0, window_bounds = array<i64: 8, 32>}, {transform_indices = @transform_1, window_bounds = array<i64: 1, 8, 128>}]} {
    %c0 = arith.constant 0 : index
    %c0_0 = arith.constant 0 : index
    %0 = vector.load %arg1[%c0, %c0_0] : memref<8x32xf32, #tpu.memory_space<vmem>>, vector<8x32xf32>
    %1 = tpu.iota {dimensions = array<i32: 0>} : vector<8x1xi32>
    %c8_i32 = arith.constant 8 : i32
    %2 = arith.muli %arg0, %c8_i32 : i32
    %3 = vector.broadcast %2 : i32 to vector<8x1xi32>
    %4 = arith.addi %3, %1 : vector<8x1xi32>
    %c8_i32_1 = arith.constant 8 : i32
    %5 = vector.broadcast %c8_i32_1 : i32 to vector<8x1xi32>
    %6 = arith.cmpi slt, %4, %5 : vector<8x1xi32>
    %cst = arith.constant dense<0xFF800000> : vector<8xf32>
    %7 = vector.multi_reduction <maximumf>, %0, %cst [1] : vector<8x32xf32> to vector<8xf32>
    %8 = vector.shape_cast %7 : vector<8xf32> to vector<8x1xf32>
    %9 = vector.broadcast %8 : vector<8x1xf32> to vector<8x32xf32>
    %10 = arith.subf %0, %9 : vector<8x32xf32>
    %11 = math.exp %10 : vector<8x32xf32>
    %cst_2 = arith.constant dense<0.000000e+00> : vector<8xf32>
    %12 = vector.multi_reduction <add>, %11, %cst_2 [1] : vector<8x32xf32> to vector<8xf32>
    %13 = vector.shape_cast %12 : vector<8xf32> to vector<8x1xf32>
    %14 = math.log %13 : vector<8x1xf32>
    %cst_3 = arith.constant 0.000000e+00 : f32
    %15 = vector.broadcast %cst_3 : f32 to vector<8x1xf32>
    %16 = arith.select %6, %14, %15 : vector<8x1xi1>, vector<8x1xf32>
    %17 = vector.shape_cast %16 : vector<8x1xf32> to vector<1x8x1xf32>
    %cst_4 = arith.constant dense<0.000000e+00> : vector<1xf32>
    %18 = vector.multi_reduction <add>, %17, %cst_4 [1, 2] : vector<1x8x1xf32> to vector<1xf32>
    %19 = vector.shape_cast %18 : vector<1xf32> to vector<1x1x1xf32>
    %20 = vector.extract %19[0, 0, 0] : f32 from vector<1x1x1xf32>
    %21 = vector.broadcast %20 : f32 to vector<1x8x128xf32>
    %c0_5 = arith.constant 0 : index
    %c0_6 = arith.constant 0 : index
    %c0_7 = arith.constant 0 : index
    %22 = vector.load %arg2[%c0_5, %c0_6, %c0_7] : memref<1x8x128xf32, #tpu.memory_space<vmem>>, vector<1x8x128xf32>
    tpu.vector_store %arg2[%c0_5, %c0_6, %c0_7], %21 {strides = array<i32>} : memref<1x8x128xf32, #tpu.memory_space<vmem>>, vector<1x8x128xf32>,
    return
  }
  func.func @transform_0(%arg0: i32) -> (i32, i32) {
    %c0_i32 = arith.constant 0 : i32
    %c0_i32_0 = arith.constant 0 : i32
    return %arg0, %c0_i32 : i32, i32
  }
  func.func @transform_1(%arg0: i32) -> (i32, i32, i32) {
    %c0_i32 = arith.constant 0 : i32
    %c0_i32_0 = arith.constant 0 : i32
    %c0_i32_1 = arith.constant 0 : i32
    return %arg0, %c0_i32, %c0_i32_0 : i32, i32, i32
  }
}

</mosaic_0001>

<bundles_post_ra>
// kernel: tpu_custom_call.1
= control target key start
LH: loop header
LB: loop body
LE: loop exit
PB: predicated region body
PF: predicated region fallthrough
CT: control target
= control target key end

     0   :  { %6 = vsyncpa [#allocation3], 0  ;;  %s151_s0 = inlined_call_operand.hbm [shape: f32[8,32], index: 0, kind: input, shape index: {}]   ;;  %s152_s1 = inlined_call_operand.hbm [shape: f32[1,8,128], index: 1, kind: output, shape index: {}]  }
   0x1   :  { %7 = vsyncpa [#allocation4], 0  ;;  %s13_s8 = sshll.u32 %s151_s0, 4  ;;  %s133_s9 = smov [#allocation2]   ;;  %s14_s8 = int_to_ptr.hbm [resolvable:$true] %s13_s8 }
   0x2   :  { %s15_s10 = sshll.u32 %s133_s9, 4  ;;  %s16_s10 = int_to_ptr.vmem [resolvable:$true] %s15_s10 }
   0x3   :  { %18 = dma.hbm_to_vmem [thread:$0]  %s14_s8, 128, %s16_s10, [#allocation3]  }
   0x4   :  { %129 = dma.done.wait [#allocation3], 128  }
   0x5   :  { %130 = vsyncadd [#allocation3], 4294967168  ;;  %vm30_vm0 = vcmask 261120   ;;  %v23_v0 = vld [vmem:[#allocation2] sm:$0xff]  ;;  %vm43_vm1 = vcmask 7168   ;;  %s134_s0 = smov [#allocation5]  }
   0x6   :  { %v31_v1 = vsel %vm30_vm0, %v23_v0, -inf  ;;  %s61_s11 = sshll.u32 %s134_s0, 4  ;;  %s63_s14 = sshll.u32 %s152_s1, 4  ;;  %s62_s11 = int_to_ptr.vmem [resolvable:$true] %s61_s11  ;;  %s64_s14 = int_to_ptr.hbm [resolvable:$true] %s63_s14 }
   0x7   :  { %32 = vmax.xlane.f32.xlu0 %v31_v1 }
  0x7a   :  { %v33_v2 = vpop.xlane.xlu0 %32 }
  0x7b   :  { %v34_v3 = vsub.f32 %v23_v0, %v33_v2 }
  0x7d   :  { %v35_v4 = vmul.f32 1.442695, %v34_v3 }
  0x7f   :  { %77 = vpow2.f32 %v35_v4 }
  0x85   :  { %v78_v5 = vpop.eup %77 }
  0x86   :  { %v37_v6 = vsel %vm30_vm0, %v78_v5, 0.0 }
  0x87   :  { %38 = vadd.xlane.f32.xlu0 %v37_v6 }
  0xfa   :  { %v39_v7 = vpop.xlane.xlu0 %38 }
  0xfb   :  { %79 = vlog2.f32 %v39_v7 }
 0x101   :  { %v80_v8 = vpop.eup %79 }
 0x102   :  { %v41_v9 = vmul.f32 0.6931472, %v80_v8 }
 0x104   :  { %v44_v10 = vsel %vm43_vm1, %v41_v9, 0.0 }
 0x105   :  { %45 = vadd.xlane.f32.xlu1 %v44_v10 }
 0x178   :  { %v46_v11 = vpop.xlane.xlu1 %45 }
 0x179   :  { %v47_v12 = vrot.slane %v46_v11, 4 }
 0x17b   :  { %v48_v13 = vadd.f32 %v47_v12, %v46_v11 }
 0x17d   :  { %v49_v14 = vrot.slane %v48_v13, 2 }
 0x17f   :  { %v50_v15 = vadd.f32 %v49_v14, %v48_v13 }
 0x181   :  { %v51_v16 = vrot.slane %v50_v15, 1 }
 0x183   :  { %v52_v17 = vadd.f32 %v51_v16, %v50_v15 }
 0x185   :  { %73 = vpush %v52_v17 }
 0x1b6   :  { %s74_s15 = spop %73 }
 0x1b7   :  { %v54_v18 = vstv %s74_s15 }
 0x1b8   :  { %55 = vst [vmem:[#allocation5] sm:$0xff] %v54_v18 }
 0x1b9   :  { %66 = dma.vmem_to_hbm [thread:$0]  %s62_s11, 128, %s64_s14, [#allocation4]  }
 0x1ba   :  { %131 = dma.done.wait [#allocation4], 128  }
 0x1bb   :  { %132 = vsyncadd [#allocation4], 4294967168 }
 0x1bc   :  { %71 = vsyncpa [#allocation3], 1 }
 0x1bd   :  { %72 = vsyncpa [#allocation4], 1 }

</bundles_post_ra>
